<compile_context>
chip_gen: v5e
topology: v5e:2x2
jax: 0.10.0
libtpu: 0.0.40
codegen_flags: <defaults>
</compile_context>

<pallas_src>
import jax
import jax.numpy as jnp
from jax.experimental import pallas as pl
from jax.experimental.pallas import tpu as pltpu

_LANES = 1024              # lane-dense width (multiple of 128)
_MAX_TILE_R = 512          # row cap: 512*1024*4B = 2 MiB f32 block
_TARGET_BLOCK_BYTES = 2 << 20
_SMALL_N = 64 * 1024       # below this, pallas_call overhead dominates


def _sublane_pack(dtype):
    # second-minor packing factor per dtype (f32: 8, bf16/f16: 16, int8/fp8: 32)
    return {4: 8, 2: 16, 1: 32}.get(jnp.dtype(dtype).itemsize, 8)


def _make_tp_kernel(inv_denom):
    def kernel(p_ref, o_ref):
        p = p_ref[...]
        scale = jnp.asarray(inv_denom, dtype=p_ref.dtype)  # stays in input dtype
        o_ref[...] = (p * p) * scale
    return kernel


def _tp_pallas_2d(x2d, inv_denom):
    R, C = x2d.shape
    itemsize = jnp.dtype(x2d.dtype).itemsize
    pack = _sublane_pack(x2d.dtype)

    # Column tile: full C (allowed even if not a 128-multiple), else 1024-wide
    # tiles with a masked partial last column block.
    tile_c = C if C <= _LANES else _LANES

    # Row tile: ~2 MiB block, multiple of the sublane packing factor, capped at
    # 512 rows (keeps double-buffered footprint <= ~8 MiB on every generation).
    tile_r = max(pack, min(_MAX_TILE_R,
                           (_TARGET_BLOCK_BYTES // max(1, tile_c * itemsize))
                           // pack * pack))
    tile_r = min(tile_r, pl.cdiv(R, pack) * pack)   # no point exceeding R

    # v7x: make sure the parallel grid has >= 2 steps so both TensorCores
    # (and both halves of the chip's HBM bandwidth) get work.
    if pl.cdiv(R, tile_r) * pl.cdiv(C, tile_c) < 2 and tile_r > pack:
        tile_r = max(pack, (tile_r // 2) // pack * pack)

    grid = (pl.cdiv(R, tile_r), pl.cdiv(C, tile_c))

    return pl.pallas_call(
        _make_tp_kernel(inv_denom),
        out_shape=jax.ShapeDtypeStruct((R, C), x2d.dtype),
        grid=grid,
        in_specs=[pl.BlockSpec((tile_r, tile_c), lambda i, j: (i, j))],
        out_specs=pl.BlockSpec((tile_r, tile_c), lambda i, j: (i, j)),
        compiler_params=pltpu.CompilerParams(
            dimension_semantics=("parallel", "parallel")),
        cost_estimate=pl.CostEstimate(
            flops=2 * R * C,
            transcendentals=0,
            bytes_accessed=2 * R * C * itemsize),
    )(x2d)


def tp_forward(p, m, l):
    """Equivalent of Tp(m, l).forward(p) = p**2 / (2*m*l**2). Any shape/float dtype."""
    inv_denom = 1.0 / (2.0 * float(m) * float(l) ** 2)
    n = p.size

    # Small-input fallback: the VPU work is nanoseconds; skip kernel overhead.
    if n < _SMALL_N:
        return (p * p) * jnp.asarray(inv_denom, dtype=p.dtype)

    orig_shape = p.shape
    if n % _LANES == 0:
        view = p.reshape(n // _LANES, _LANES)        # free bitcast, lane-dense
    else:
        last = orig_shape[-1]
        view = p.reshape(n // last, last)            # free bitcast, natural 2D collapse

    out2d = _tp_pallas_2d(view, inv_denom)
    return out2d.reshape(orig_shape)


if __name__ == "__main__":
    # Module hyperparameters (Python scalars, as in Tp(m, l))
    m = 1.5
    l = 0.75

    key = jax.random.PRNGKey(0)
    k1, k2, k3, k4 = jax.random.split(key, 4)

    def ref_fn(x):
        return x ** 2 / (2 * m * l ** 2)

    # 1) Small NCHW-like input -> plain-JAX small-input fast path
    x_small = jax.random.normal(k1, (2, 4, 16, 16), dtype=jnp.float32)
    out_small = jax.block_until_ready(tp_forward(x_small, m, l))
    assert out_small.shape == x_small.shape and out_small.dtype == x_small.dtype
    assert jnp.allclose(out_small, ref_fn(x_small), rtol=1e-6, atol=1e-6)

    # 2) Lane-aligned input -> Pallas kernel, lane-dense (rows, 1024) view
    x_aligned = jax.random.normal(k2, (2, 4, 128, 128), dtype=jnp.float32)
    out_aligned = jax.block_until_ready(tp_forward(x_aligned, m, l))
    assert out_aligned.shape == x_aligned.shape and out_aligned.dtype == x_aligned.dtype
    assert jnp.allclose(out_aligned, ref_fn(x_aligned), rtol=1e-6, atol=1e-6)

    # 3) Ragged input -> Pallas kernel, natural 2D collapse, masked boundary blocks
    x_ragged = jax.random.normal(k3, (100, 777), dtype=jnp.float32)
    out_ragged = jax.block_until_ready(tp_forward(x_ragged, m, l))
    assert out_ragged.shape == x_ragged.shape
    assert jnp.allclose(out_ragged, ref_fn(x_ragged), rtol=1e-6, atol=1e-6)

    # 4) bf16 input -> dtype-aware sublane packing (16-row multiples)
    x_bf16 = jax.random.normal(k4, (64, 2048), dtype=jnp.bfloat16)
    out_bf16 = jax.block_until_ready(tp_forward(x_bf16, m, l))
    assert out_bf16.shape == x_bf16.shape and out_bf16.dtype == x_bf16.dtype
    assert jnp.allclose(out_bf16.astype(jnp.float32),
                        ref_fn(x_bf16.astype(jnp.float32)),
                        rtol=3e-2, atol=3e-2)

    print("KERNEL_OK")
</pallas_src>

<mosaic_0001>
module attributes {stable_mosaic.version = 11 : i64} {
  func.func @kernel(%arg0: i32, %arg1: i32, %arg2: memref<64x1024xf32, #tpu.memory_space<vmem>>, %arg3: memref<64x1024xf32, #tpu.memory_space<vmem>>) attributes {dimension_semantics = [#tpu.dimension_semantics<parallel>, #tpu.dimension_semantics<parallel>], iteration_bounds = array<i64: 2, 1>, scalar_prefetch = 0 : i64, scratch_operands = 0 : i64, tpu.core_type = #tpu.core_type<tc>, window_params = [{transform_indices = @transform_0, window_bounds = array<i64: 64, 1024>}, {transform_indices = @transform_1, window_bounds = array<i64: 64, 1024>}]} {
    %c0 = arith.constant 0 : index
    %c0_0 = arith.constant 0 : index
    %0 = vector.load %arg2[%c0, %c0_0] : memref<64x1024xf32, #tpu.memory_space<vmem>>, vector<64x1024xf32>
    %1 = arith.mulf %0, %0 : vector<64x1024xf32>
    %cst = arith.constant 0.592592597 : f32
    %2 = vector.broadcast %cst : f32 to vector<64x1024xf32>
    %3 = arith.mulf %1, %2 : vector<64x1024xf32>
    %c0_1 = arith.constant 0 : index
    %c0_2 = arith.constant 0 : index
    %4 = vector.load %arg3[%c0_1, %c0_2] : memref<64x1024xf32, #tpu.memory_space<vmem>>, vector<64x1024xf32>
    tpu.vector_store %arg3[%c0_1, %c0_2], %3 {strides = array<i32>} : memref<64x1024xf32, #tpu.memory_space<vmem>>, vector<64x1024xf32>,
    return
  }
  func.func @transform_0(%arg0: i32, %arg1: i32) -> (i32, i32) {
    %c0_i32 = arith.constant 0 : i32
    return %arg0, %arg1 : i32, i32
  }
  func.func @transform_1(%arg0: i32, %arg1: i32) -> (i32, i32) {
    %c0_i32 = arith.constant 0 : i32
    return %arg0, %arg1 : i32, i32
  }
}

</mosaic_0001>

<bundles_post_ra>
// kernel: tpu_custom_call.1
= control target key start
LH: loop header
LB: loop body
LE: loop exit
PB: predicated region body
PF: predicated region fallthrough
CT: control target
= control target key end

     0   :  { %6 = vsyncpa [#allocation3], 0  ;;  %s990_s0 = inlined_call_operand.hbm [shape: f32[128,1024], index: 0, kind: input, shape index: {}]   ;;  %s991_s1 = inlined_call_operand.hbm [shape: f32[128,1024], index: 1, kind: output, shape index: {}]  }
   0x1   :  { %8 = vsyncpa [#allocation3 + $0x1], 0 }
   0x2   :  { %9 = vsyncpa [#allocation4], 0 }
   0x3   :  { %11 = vsyncpa [#allocation4 + $0x1], 0  ;;  %s737_s6 = smov 0   ;;  %s739_s7 = smov 0  }
   0x4   :  { %s741_s8 = smov 0   ;;  %s743_s9 = smov 0  }
   0x5   :  { %s745_s10 = smov 0   ;;  %s747_s11 = smov 0  }
   0x6 LB: > { %s522_s12 = sadd.s32 4294967295, %s721_s11   ;;  %s523_s13 = sadd.s32 4294967294, %s721_s11   ;;  %s721_s11 = sphi %s747_s11, %s17_s11   ;;  %s717_s10 = sphi %s745_s10, %s1000_s10   ;;  %s713_s9 = sphi %s743_s9, %s999_s9   ;;  %s709_s8 = sphi %s741_s8, %s998_s8   ;;  %s705_s7 = sphi %s739_s7, %s997_s7   ;;  %s701_s6 = sphi %s737_s6, %s996_s6  }
   0x7   : > { %s29_s14 = sadd.s32 1, %s717_s10  ;;  %s38_s15 = sadd.s32 1, %s709_s8 }
   0x8   : > { %p31_p0 = scmp.ge.s32.totalorder %s29_s14, 2  ;;  %p45_p1 = scmp.ne.s32.totalorder %s709_s8, %s705_s7 }
   0x9   : > { %p46_p2 = scmp.eq.s32.totalorder %s721_s11, 0  ;;  %p51_p3 = scmp.ne.s32.totalorder %s705_s7, %s701_s6 }
   0xa   : > { %s1002_s14 = smov (%p31_p0, %s29_s14), 0  ;;  %p52_p5 = scmp.eq.s32.totalorder %s522_s12, 0 }
   0xb   : > { %p778_p4 = por %p46_p2, %p45_p1  ;;  %s33_s17 = ssub.s32 %s717_s10, %s1002_s14 }
   0xc   : > { %p77_p6 = scmp.eq.s32.totalorder %s522_s12, 1  ;;  %p36_p7 = scmp.eq.s32.totalorder %s33_s17, 0 }
   0xd   : > { %p784_p8 = por %p52_p5, %p51_p3  ;;  %p83_p10 = scmp.eq.s32.totalorder %s523_s13, 1 }
   0xe   : > { %p788_p9 = por %p77_p6, %p45_p1  ;;  %p525_p12 = scmp.ge.s32.totalorder %s721_s11, 2 }
   0xf   : > { %s793_s20 = scalar_select %p36_p7, %s709_s8, %s38_s15  }
  0x10   : > { %p795_p11 = por %p83_p10, %p51_p3  ;;  %p555_p13 = scmp.lt.s32.totalorder %s721_s11, 2 }
  0x11   : > { %s103_s22 = sand.u32 1, %s709_s8   ;;  %s540_s24 = sshll.u32 %s717_s10, 9 }
  0x12   : > { %s526_s23 = sshll.u32 %s103_s22, 9  ;;  %s115_s27 = scalar_lea.hbm %s990_s0, %s540_s24 }
  0x13   : > { %s107_s28 = scalar_lea.vmem [#allocation2], %s526_s23  ;;  %s116_s30 = sshll.u32 %s115_s27, 4  ;;  %s117_s30 = int_to_ptr.hbm [resolvable:$true] %s116_s30 }
  0x14   : > { %s118_s29 = sshll.u32 %s107_s28, 4  ;;  %p548_p0 = pnand %p555_p13, %p778_p4  ;;  %s119_s29 = int_to_ptr.vmem [resolvable:$true] %s118_s29 }
  0x15   : > { %p530_p1 = scmp.ge.s32.totalorder %s721_s11, 1  ;;  %s104_s2 = scalar_lea.sflag [#allocation3], %s103_s22 }
  0x16   : > { %s723_s3 = smov 1024   ;;  %s724_s4 = smov 64  }
  0x17   : > { %550 = dma.hbm_to_vmem [thread:$0]  (!%p548_p0), %s117_s30, 8192, %s119_s29, %s104_s2, %s723_s3, %s723_s3, %s724_s4  }
  0x18   : > { %p126_p2 = scmp.lt.s32.totalorder %s721_s11, 3 }
  0x1a   : > { %p127_p3 = pnand %p530_p1, %p126_p2 }
  0x1b   : > { %s811_s5 = sand.u32 (!%p127_p3), 1, %s705_s7  }
  0x1c   : > { %130 = sbr.rel (%p127_p3) target bundleno = 106 (0x6a), region = 24  ;;  %s531_s12 = sshll.u32 (!%p127_p3), %s811_s5, 9 }
  0x1d   : > { %s133_s13 = scalar_lea.sflag (!%p127_p3), [#allocation3], %s811_s5  ;;  %s815_s15 = scalar_lea.vmem (!%p127_p3), [#allocation2], %s531_s12 }
  0x21   : > { %692 = dma.done.wait (%p784_p8), %s133_s13, 8192  }
  0x22   : > { %694 = vsyncadd (%p784_p8), %s133_s13, 4294959104  ;;  %v160_v0 = vld [vmem:[%s815_s15] sm:$0xff]  ;;  %v161_v1 = vld [vmem:[%s815_s15 + $0x8] sm:$0xff]  ;;  %s830_s16 = scalar_lea.vmem [#allocation5], %s531_s12  ;;  %s542_s17 = sshll.u32 %s713_s9, 9 }
  0x23   : > { %v162_v2 = vld [vmem:[%s815_s15 + $0x10] sm:$0xff]  ;;  %v224_v3 = vmul.f32 %v160_v0, %v160_v0  ;;  %v225_v4 = vmul.f32 %v161_v1, %v161_v1  ;;  %v163_v6 = vld [vmem:[%s815_s15 + $0x18] sm:$0xff]  ;;  %v164_v7 = vld [vmem:[%s815_s15 + $0x20] sm:$0xff]  ;;  %s431_s23 = scalar_lea.hbm %s991_s1, %s542_s17  ;;  %s432_s9 = sshll.u32 %s830_s16, 4  ;;  %s433_s9 = int_to_ptr.vmem [resolvable:$true] %s432_s9 }
  0x24   : > { %v226_v5 = vmul.f32 %v162_v2, %v162_v2  ;;  %v165_v8 = vld [vmem:[%s815_s15 + $0x28] sm:$0xff]  ;;  %v227_v9 = vmul.f32 %v163_v6, %v163_v6  ;;  %v228_v10 = vmul.f32 %v164_v7, %v164_v7  ;;  %v166_v12 = vld [vmem:[%s815_s15 + $0x30] sm:$0xff]  ;;  %v167_v13 = vld [vmem:[%s815_s15 + $0x38] sm:$0xff]  ;;  %s434_s24 = sshll.u32 %s431_s23, 4  ;;  %s417_s25 = scalar_lea.sflag [#allocation4], %s811_s5  ;;  %s435_s24 = int_to_ptr.hbm [resolvable:$true] %s434_s24 }
  0x25   : > { %v229_v11 = vmul.f32 %v165_v8, %v165_v8  ;;  %v168_v14 = vld [vmem:[%s815_s15 + $0x40] sm:$0xff]  ;;  %v288_v15 = vmul.f32 0.5925926, %v224_v3  ;;  %v289_v16 = vmul.f32 0.5925926, %v225_v4  ;;  %v230_v18 = vmul.f32 %v166_v12, %v166_v12  ;;  %v169_v23 = vld [vmem:[%s815_s15 + $0x48] sm:$0xff] }
  0x26   : > { %v290_v17 = vmul.f32 0.5925926, %v226_v5  ;;  %v291_v19 = vmul.f32 0.5925926, %v227_v9  ;;  %v231_v20 = vmul.f32 %v167_v13, %v167_v13  ;;  %v292_v21 = vmul.f32 0.5925926, %v228_v10 }
  0x27   : > { %352 = vst [vmem:[%s830_s16] sm:$0xff] %v288_v15  ;;  %v232_v22 = vmul.f32 %v168_v14, %v168_v14  ;;  %v170_v24 = vld [vmem:[%s815_s15 + $0x50] sm:$0xff]  ;;  %v171_v25 = vld [vmem:[%s815_s15 + $0x58] sm:$0xff]  ;;  %v293_v26 = vmul.f32 0.5925926, %v229_v11  ;;  %v233_v27 = vmul.f32 %v169_v23, %v169_v23  ;;  %v172_v28 = vld [vmem:[%s815_s15 + $0x60] sm:$0xff]  ;;  %s653_s26 = sshra.s32 %s435_s24, 4  ;;  %s654_s26 = int_to_ptr.hbm [resolvable:$true] %s653_s26 }
  0x28   : > { %353 = vst [vmem:[%s830_s16 + $0x8] sm:$0xff] %v289_v16  ;;  %v294_v29 = vmul.f32 0.5925926, %v230_v18  ;;  %v234_v30 = vmul.f32 %v170_v24, %v170_v24  ;;  %v173_v31 = vld [vmem:[%s815_s15 + $0x68] sm:$0xff]  ;;  %v295_v32 = vmul.f32 0.5925926, %v231_v20  ;;  %v235_v33 = vmul.f32 %v171_v25, %v171_v25  ;;  %p660_p7 = scmp.lt.s32.totalorder %s654_s26, %s991_s1 }
  0x29   : > { %354 = vst [vmem:[%s830_s16 + $0x10] sm:$0xff] %v290_v17  ;;  %v174_v34 = vld [vmem:[%s815_s15 + $0x70] sm:$0xff]  ;;  %v296_v35 = vmul.f32 0.5925926, %v232_v22  ;;  %v236_v36 = vmul.f32 %v172_v28, %v172_v28  ;;  %v175_v37 = vld [vmem:[%s815_s15 + $0x78] sm:$0xff]  ;;  %v237_v39 = vmul.f32 %v173_v31, %v173_v31  ;;  %v176_v40 = vld [vmem:[%s815_s15 + $0x80] sm:$0xff] }
  0x2a   : > { %355 = vst [vmem:[%s830_s16 + $0x18] sm:$0xff] %v291_v19  ;;  %v297_v38 = vmul.f32 0.5925926, %v233_v27  ;;  %v298_v41 = vmul.f32 0.5925926, %v234_v30  ;;  %v238_v42 = vmul.f32 %v174_v34, %v174_v34  ;;  %v177_v43 = vld [vmem:[%s815_s15 + $0x88] sm:$0xff]  ;;  %v239_v45 = vmul.f32 %v175_v37, %v175_v37 }
  0x2b   : > { %356 = vst [vmem:[%s830_s16 + $0x20] sm:$0xff] %v292_v21  ;;  %v299_v44 = vmul.f32 0.5925926, %v235_v33  ;;  %v178_v46 = vld [vmem:[%s815_s15 + $0x90] sm:$0xff]  ;;  %v300_v47 = vmul.f32 0.5925926, %v236_v36  ;;  %v240_v48 = vmul.f32 %v176_v40, %v176_v40  ;;  %v241_v51 = vmul.f32 %v177_v43, %v177_v43 }
  0x2c   : > { %357 = vst [vmem:[%s830_s16 + $0x28] sm:$0xff] %v293_v26  ;;  %v179_v49 = vld [vmem:[%s815_s15 + $0x98] sm:$0xff]  ;;  %v301_v50 = vmul.f32 0.5925926, %v237_v39  ;;  %v180_v52 = vld [vmem:[%s815_s15 + $0xa0] sm:$0xff]  ;;  %v242_v54 = vmul.f32 %v178_v46, %v178_v46  ;;  %v181_v55 = vld [vmem:[%s815_s15 + $0xa8] sm:$0xff] }
  0x2d   : > { %358 = vst [vmem:[%s830_s16 + $0x30] sm:$0xff] %v294_v29  ;;  %v302_v53 = vmul.f32 0.5925926, %v238_v42  ;;  %v303_v56 = vmul.f32 0.5925926, %v239_v45  ;;  %v243_v57 = vmul.f32 %v179_v49, %v179_v49  ;;  %v182_v58 = vld [vmem:[%s815_s15 + $0xb0] sm:$0xff]  ;;  %v244_v60 = vmul.f32 %v180_v52, %v180_v52 }
  0x2e   : > { %359 = vst [vmem:[%s830_s16 + $0x38] sm:$0xff] %v295_v32  ;;  %v304_v59 = vmul.f32 0.5925926, %v240_v48  ;;  %v183_v61 = vld [vmem:[%s815_s15 + $0xb8] sm:$0xff]  ;;  %v305_v62 = vmul.f32 0.5925926, %v241_v51  ;;  %v245_v63 = vmul.f32 %v181_v55, %v181_v55  ;;  %v246_v2 = vmul.f32 %v182_v58, %v182_v58 }
  0x2f   : > { %360 = vst [vmem:[%s830_s16 + $0x40] sm:$0xff] %v296_v35  ;;  %v184_v0 = vld [vmem:[%s815_s15 + $0xc0] sm:$0xff]  ;;  %v306_v1 = vmul.f32 0.5925926, %v242_v54  ;;  %v185_v3 = vld [vmem:[%s815_s15 + $0xc8] sm:$0xff]  ;;  %v247_v5 = vmul.f32 %v183_v61, %v183_v61  ;;  %v186_v6 = vld [vmem:[%s815_s15 + $0xd0] sm:$0xff] }
  0x30   : > { %361 = vst [vmem:[%s830_s16 + $0x48] sm:$0xff] %v297_v38  ;;  %v307_v4 = vmul.f32 0.5925926, %v243_v57  ;;  %v308_v7 = vmul.f32 0.5925926, %v244_v60  ;;  %v248_v8 = vmul.f32 %v184_v0, %v184_v0  ;;  %v187_v9 = vld [vmem:[%s815_s15 + $0xd8] sm:$0xff]  ;;  %v249_v11 = vmul.f32 %v185_v3, %v185_v3 }
  0x31   : > { %362 = vst [vmem:[%s830_s16 + $0x50] sm:$0xff] %v298_v41  ;;  %v309_v10 = vmul.f32 0.5925926, %v245_v63  ;;  %v188_v12 = vld [vmem:[%s815_s15 + $0xe0] sm:$0xff]  ;;  %v310_v13 = vmul.f32 0.5925926, %v246_v2  ;;  %v250_v14 = vmul.f32 %v186_v6, %v186_v6  ;;  %v251_v17 = vmul.f32 %v187_v9, %v187_v9 }
  0x32   : > { %363 = vst [vmem:[%s830_s16 + $0x58] sm:$0xff] %v299_v44  ;;  %v189_v15 = vld [vmem:[%s815_s15 + $0xe8] sm:$0xff]  ;;  %v311_v16 = vmul.f32 0.5925926, %v247_v5  ;;  %v190_v18 = vld [vmem:[%s815_s15 + $0xf0] sm:$0xff]  ;;  %v252_v20 = vmul.f32 %v188_v12, %v188_v12  ;;  %v191_v21 = vld [vmem:[%s815_s15 + $0xf8] sm:$0xff] }
  0x33   : > { %364 = vst [vmem:[%s830_s16 + $0x60] sm:$0xff] %v300_v47  ;;  %v312_v19 = vmul.f32 0.5925926, %v248_v8  ;;  %v313_v22 = vmul.f32 0.5925926, %v249_v11  ;;  %v253_v23 = vmul.f32 %v189_v15, %v189_v15  ;;  %v192_v24 = vld [vmem:[%s815_s15 + $0x100] sm:$0xff]  ;;  %v254_v26 = vmul.f32 %v190_v18, %v190_v18 }
  0x34   : > { %365 = vst [vmem:[%s830_s16 + $0x68] sm:$0xff] %v301_v50  ;;  %v314_v25 = vmul.f32 0.5925926, %v250_v14  ;;  %v193_v27 = vld [vmem:[%s815_s15 + $0x108] sm:$0xff]  ;;  %v315_v28 = vmul.f32 0.5925926, %v251_v17  ;;  %v255_v29 = vmul.f32 %v191_v21, %v191_v21  ;;  %v256_v32 = vmul.f32 %v192_v24, %v192_v24 }
  0x35   : > { %366 = vst [vmem:[%s830_s16 + $0x70] sm:$0xff] %v302_v53  ;;  %v194_v30 = vld [vmem:[%s815_s15 + $0x110] sm:$0xff]  ;;  %v316_v31 = vmul.f32 0.5925926, %v252_v20  ;;  %v195_v33 = vld [vmem:[%s815_s15 + $0x118] sm:$0xff]  ;;  %v257_v35 = vmul.f32 %v193_v27, %v193_v27  ;;  %v196_v36 = vld [vmem:[%s815_s15 + $0x120] sm:$0xff] }
  0x36   : > { %367 = vst [vmem:[%s830_s16 + $0x78] sm:$0xff] %v303_v56  ;;  %v317_v34 = vmul.f32 0.5925926, %v253_v23  ;;  %v318_v37 = vmul.f32 0.5925926, %v254_v26  ;;  %v258_v38 = vmul.f32 %v194_v30, %v194_v30  ;;  %v197_v39 = vld [vmem:[%s815_s15 + $0x128] sm:$0xff]  ;;  %v259_v41 = vmul.f32 %v195_v33, %v195_v33 }
  0x37   : > { %368 = vst [vmem:[%s830_s16 + $0x80] sm:$0xff] %v304_v59  ;;  %v319_v40 = vmul.f32 0.5925926, %v255_v29  ;;  %v198_v42 = vld [vmem:[%s815_s15 + $0x130] sm:$0xff]  ;;  %v320_v43 = vmul.f32 0.5925926, %v256_v32  ;;  %v260_v44 = vmul.f32 %v196_v36, %v196_v36  ;;  %v261_v47 = vmul.f32 %v197_v39, %v197_v39 }
  0x38   : > { %369 = vst [vmem:[%s830_s16 + $0x88] sm:$0xff] %v305_v62  ;;  %v199_v45 = vld [vmem:[%s815_s15 + $0x138] sm:$0xff]  ;;  %v321_v46 = vmul.f32 0.5925926, %v257_v35  ;;  %v200_v48 = vld [vmem:[%s815_s15 + $0x140] sm:$0xff]  ;;  %v262_v50 = vmul.f32 %v198_v42, %v198_v42  ;;  %v201_v51 = vld [vmem:[%s815_s15 + $0x148] sm:$0xff] }
  0x39   : > { %370 = vst [vmem:[%s830_s16 + $0x90] sm:$0xff] %v306_v1  ;;  %v322_v49 = vmul.f32 0.5925926, %v258_v38  ;;  %v323_v52 = vmul.f32 0.5925926, %v259_v41  ;;  %v263_v53 = vmul.f32 %v199_v45, %v199_v45  ;;  %v202_v54 = vld [vmem:[%s815_s15 + $0x150] sm:$0xff]  ;;  %v264_v56 = vmul.f32 %v200_v48, %v200_v48 }
  0x3a   : > { %371 = vst [vmem:[%s830_s16 + $0x98] sm:$0xff] %v307_v4  ;;  %v324_v55 = vmul.f32 0.5925926, %v260_v44  ;;  %v203_v57 = vld [vmem:[%s815_s15 + $0x158] sm:$0xff]  ;;  %v325_v58 = vmul.f32 0.5925926, %v261_v47  ;;  %v265_v59 = vmul.f32 %v201_v51, %v201_v51  ;;  %v266_v62 = vmul.f32 %v202_v54, %v202_v54 }
  0x3b   : > { %372 = vst [vmem:[%s830_s16 + $0xa0] sm:$0xff] %v308_v7  ;;  %v204_v60 = vld [vmem:[%s815_s15 + $0x160] sm:$0xff]  ;;  %v326_v61 = vmul.f32 0.5925926, %v262_v50  ;;  %v205_v63 = vld [vmem:[%s815_s15 + $0x168] sm:$0xff]  ;;  %v267_v1 = vmul.f32 %v203_v57, %v203_v57  ;;  %v206_v2 = vld [vmem:[%s815_s15 + $0x170] sm:$0xff] }
  0x3c   : > { %373 = vst [vmem:[%s830_s16 + $0xa8] sm:$0xff] %v309_v10  ;;  %v327_v0 = vmul.f32 0.5925926, %v263_v53  ;;  %v328_v3 = vmul.f32 0.5925926, %v264_v56  ;;  %v268_v4 = vmul.f32 %v204_v60, %v204_v60  ;;  %v207_v5 = vld [vmem:[%s815_s15 + $0x178] sm:$0xff]  ;;  %v269_v7 = vmul.f32 %v205_v63, %v205_v63 }
  0x3d   : > { %374 = vst [vmem:[%s830_s16 + $0xb0] sm:$0xff] %v310_v13  ;;  %v329_v6 = vmul.f32 0.5925926, %v265_v59  ;;  %v208_v8 = vld [vmem:[%s815_s15 + $0x180] sm:$0xff]  ;;  %v330_v9 = vmul.f32 0.5925926, %v266_v62  ;;  %v270_v10 = vmul.f32 %v206_v2, %v206_v2  ;;  %v271_v13 = vmul.f32 %v207_v5, %v207_v5 }
  0x3e   : > { %375 = vst [vmem:[%s830_s16 + $0xb8] sm:$0xff] %v311_v16  ;;  %v209_v11 = vld [vmem:[%s815_s15 + $0x188] sm:$0xff]  ;;  %v331_v12 = vmul.f32 0.5925926, %v267_v1  ;;  %v210_v14 = vld [vmem:[%s815_s15 + $0x190] sm:$0xff]  ;;  %v272_v16 = vmul.f32 %v208_v8, %v208_v8  ;;  %v211_v17 = vld [vmem:[%s815_s15 + $0x198] sm:$0xff] }
  0x3f   : > { %376 = vst [vmem:[%s830_s16 + $0xc0] sm:$0xff] %v312_v19  ;;  %v332_v15 = vmul.f32 0.5925926, %v268_v4  ;;  %v333_v18 = vmul.f32 0.5925926, %v269_v7  ;;  %v273_v19 = vmul.f32 %v209_v11, %v209_v11  ;;  %v212_v20 = vld [vmem:[%s815_s15 + $0x1a0] sm:$0xff] }
  0x40   : > { %377 = vst [vmem:[%s830_s16 + $0xc8] sm:$0xff] %v313_v22  ;;  %v334_v21 = vmul.f32 0.5925926, %v270_v10  ;;  %v274_v22 = vmul.f32 %v210_v14, %v210_v14  ;;  %v213_v23 = vld [vmem:[%s815_s15 + $0x1a8] sm:$0xff]  ;;  %v335_v24 = vmul.f32 0.5925926, %v271_v13 }
  0x41   : > { %378 = vst [vmem:[%s830_s16 + $0xd0] sm:$0xff] %v314_v25  ;;  %v275_v25 = vmul.f32 %v211_v17, %v211_v17  ;;  %v214_v26 = vld [vmem:[%s815_s15 + $0x1b0] sm:$0xff]  ;;  %v336_v27 = vmul.f32 0.5925926, %v272_v16  ;;  %v215_v29 = vld [vmem:[%s815_s15 + $0x1b8] sm:$0xff]  ;;  %v216_v32 = vld [vmem:[%s815_s15 + $0x1c0] sm:$0xff] }
  0x42   : > { %379 = vst [vmem:[%s830_s16 + $0xd8] sm:$0xff] %v315_v28  ;;  %v276_v28 = vmul.f32 %v212_v20, %v212_v20  ;;  %v337_v30 = vmul.f32 0.5925926, %v273_v19  ;;  %v338_v33 = vmul.f32 0.5925926, %v274_v22  ;;  %v217_v35 = vld [vmem:[%s815_s15 + $0x1c8] sm:$0xff] }
  0x43   : > { %380 = vst [vmem:[%s830_s16 + $0xe0] sm:$0xff] %v316_v31  ;;  %v277_v31 = vmul.f32 %v213_v23, %v213_v23  ;;  %v339_v36 = vmul.f32 0.5925926, %v275_v25  ;;  %v218_v38 = vld [vmem:[%s815_s15 + $0x1d0] sm:$0xff]  ;;  %v219_v41 = vld [vmem:[%s815_s15 + $0x1d8] sm:$0xff]  ;;  %v220_v44 = vld [vmem:[%s815_s15 + $0x1e0] sm:$0xff] }
  0x44   : > { %381 = vst [vmem:[%s830_s16 + $0xe8] sm:$0xff] %v317_v34  ;;  %v278_v34 = vmul.f32 %v214_v26, %v214_v26  ;;  %v340_v39 = vmul.f32 0.5925926, %v276_v28  ;;  %v221_v47 = vld [vmem:[%s815_s15 + $0x1e8] sm:$0xff]  ;;  %v222_v50 = vld [vmem:[%s815_s15 + $0x1f0] sm:$0xff]  ;;  %v223_v53 = vld [vmem:[%s815_s15 + $0x1f8] sm:$0xff] }
  0x45   : > { %382 = vst [vmem:[%s830_s16 + $0xf0] sm:$0xff] %v318_v37  ;;  %v279_v37 = vmul.f32 %v215_v29, %v215_v29  ;;  %v341_v42 = vmul.f32 0.5925926, %v277_v31  ;;  %v286_v57 = vmul.f32 %v222_v50, %v222_v50  ;;  %v287_v59 = vmul.f32 %v223_v53, %v223_v53  ;;  %s655_s27 = scalar_lea.hbm %s654_s26, 512  ;;  %s659_s30 = scalar_lea.hbm %s991_s1, 1024 }
  0x46   : > { %383 = vst [vmem:[%s830_s16 + $0xf8] sm:$0xff] %v319_v40  ;;  %v280_v40 = vmul.f32 %v216_v32, %v216_v32  ;;  %v342_v45 = vmul.f32 0.5925926, %v278_v34  ;;  %p656_p4 = scmp.ne.s32.totalorder %s654_s26, %s655_s27  ;;  %p661_p8 = scmp.lt.s32.totalorder %s659_s30, %s655_s27 }
  0x47   : > { %384 = vst [vmem:[%s830_s16 + $0x100] sm:$0xff] %v320_v43  ;;  %v281_v43 = vmul.f32 %v217_v35, %v217_v35  ;;  %v343_v48 = vmul.f32 0.5925926, %v279_v37  ;;  %v350_v62 = vmul.f32 0.5925926, %v286_v57 }
  0x48   : > { %385 = vst [vmem:[%s830_s16 + $0x108] sm:$0xff] %v321_v46  ;;  %v282_v46 = vmul.f32 %v218_v38, %v218_v38  ;;  %v344_v51 = vmul.f32 0.5925926, %v280_v40  ;;  %v351_v63 = vmul.f32 0.5925926, %v287_v59  ;;  %p657_p5 = pnand %p656_p4, %p788_p9  ;;  %p662_p10 = por %p661_p8, %p660_p7 }
  0x49   : > { %386 = vst [vmem:[%s830_s16 + $0x110] sm:$0xff] %v322_v49  ;;  %v283_v49 = vmul.f32 %v219_v41, %v219_v41  ;;  %v345_v54 = vmul.f32 0.5925926, %v281_v43 }
  0x4a   : > { %387 = vst [vmem:[%s830_s16 + $0x118] sm:$0xff] %v323_v52  ;;  %v284_v52 = vmul.f32 %v220_v44, %v220_v44  ;;  %v346_v56 = vmul.f32 0.5925926, %v282_v46  ;;  %p658_p6 = pneg %p657_p5 }
  0x4b   : > { %388 = vst [vmem:[%s830_s16 + $0x120] sm:$0xff] %v324_v55  ;;  %v285_v55 = vmul.f32 %v221_v47, %v221_v47 }
  0x4c   : > { %389 = vst [vmem:[%s830_s16 + $0x128] sm:$0xff] %v325_v58  ;;  %v347_v58 = vmul.f32 0.5925926, %v283_v49  ;;  %v348_v60 = vmul.f32 0.5925926, %v284_v52  ;;  %p663_p13 = pnand %p662_p10, %p658_p6 }
  0x4d   : > { %390 = vst [vmem:[%s830_s16 + $0x130] sm:$0xff] %v326_v61  ;;  %v349_v61 = vmul.f32 0.5925926, %v285_v55 }
  0x4e   : > { %391 = vst [vmem:[%s830_s16 + $0x138] sm:$0xff] %v327_v0 }
  0x4f   : > { %392 = vst [vmem:[%s830_s16 + $0x140] sm:$0xff] %v328_v3 }
  0x50   : > { %393 = vst [vmem:[%s830_s16 + $0x148] sm:$0xff] %v329_v6 }
  0x51   : > { %394 = vst [vmem:[%s830_s16 + $0x150] sm:$0xff] %v330_v9 }
  0x52   : > { %395 = vst [vmem:[%s830_s16 + $0x158] sm:$0xff] %v331_v12 }
  0x53   : > { %396 = vst [vmem:[%s830_s16 + $0x160] sm:$0xff] %v332_v15 }
  0x54   : > { %397 = vst [vmem:[%s830_s16 + $0x168] sm:$0xff] %v333_v18 }
  0x55   : > { %398 = vst [vmem:[%s830_s16 + $0x170] sm:$0xff] %v334_v21 }
  0x56   : > { %399 = vst [vmem:[%s830_s16 + $0x178] sm:$0xff] %v335_v24 }
  0x57   : > { %400 = vst [vmem:[%s830_s16 + $0x180] sm:$0xff] %v336_v27 }
  0x58   : > { %401 = vst [vmem:[%s830_s16 + $0x188] sm:$0xff] %v337_v30 }
  0x59   : > { %402 = vst [vmem:[%s830_s16 + $0x190] sm:$0xff] %v338_v33 }
  0x5a   : > { %403 = vst [vmem:[%s830_s16 + $0x198] sm:$0xff] %v339_v36 }
  0x5b   : > { %404 = vst [vmem:[%s830_s16 + $0x1a0] sm:$0xff] %v340_v39 }
  0x5c   : > { %405 = vst [vmem:[%s830_s16 + $0x1a8] sm:$0xff] %v341_v42 }
  0x5d   : > { %406 = vst [vmem:[%s830_s16 + $0x1b0] sm:$0xff] %v342_v45 }
  0x5e   : > { %407 = vst [vmem:[%s830_s16 + $0x1b8] sm:$0xff] %v343_v48 }
  0x5f   : > { %408 = vst [vmem:[%s830_s16 + $0x1c0] sm:$0xff] %v344_v51 }
  0x60   : > { %409 = vst [vmem:[%s830_s16 + $0x1c8] sm:$0xff] %v345_v54 }
  0x61   : > { %410 = vst [vmem:[%s830_s16 + $0x1d0] sm:$0xff] %v346_v56 }
  0x62   : > { %411 = vst [vmem:[%s830_s16 + $0x1d8] sm:$0xff] %v347_v58 }
  0x63   : > { %412 = vst [vmem:[%s830_s16 + $0x1e0] sm:$0xff] %v348_v60 }
  0x64   : > { %413 = vst [vmem:[%s830_s16 + $0x1e8] sm:$0xff] %v349_v61 }
  0x65   : > { %414 = vst [vmem:[%s830_s16 + $0x1f0] sm:$0xff] %v350_v62 }
  0x66   : > { %415 = vst [vmem:[%s830_s16 + $0x1f8] sm:$0xff] %v351_v63 }
  0x67   : > { %666 = shalt.err (!%p663_p13)
}
  0x68   : > { %s725_s4 = smov 1024   ;;  %s726_s5 = smov 64  }
  0x69   : > { %545 = dma.vmem_to_hbm [thread:$0]  (%p788_p9), %s433_s9, 8192, %s435_s24, %s417_s25, %s725_s4, %s725_s4, %s726_s5  }
  0x6a PF: > { %s449_s12 = sand.u32 1, %s701_s6   ;;  %p552_p0 = pnand %p525_p12, %p795_p11 }
  0x6b   : > { %s450_s13 = scalar_lea.sflag [#allocation4], %s449_s12 }
  0x6c   : > { %p553_p1 = pneg %p552_p0 }
  0x6e   : > { %696 = dma.done.wait (%p553_p1), %s450_s13, 8192  }
  0x6f   : > { %698 = vsyncadd (%p553_p1), %s450_s13, 4294959104  ;;  %s17_s11 = sadd.s32 1, %s721_s11   ;;  %s996_s6 = smov %s705_s7 }
  0x70   : > { %p14_p2 = scmp.ge.s32.totalorder %s17_s11, 4   ;;  %s997_s7 = smov %s709_s8 }
  0x71   : > { %s998_s8 = smov %s793_s20  ;;  %s999_s9 = smov %s717_s10 }
  0x72   : > { %s1000_s10 = smov %s1002_s14  ;;  %16 = sbr.rel (!%p14_p2) target bundleno = 6 (0x6), region = 69 }
  0x77   :  { %456 = vsyncpa [#allocation3], 1 }
  0x78   :  { %458 = vsyncpa [#allocation3 + $0x1], 1 }
  0x79   :  { %459 = vsyncpa [#allocation4], 1 }
  0x7a   :  { %461 = vsyncpa [#allocation4 + $0x1], 1 }

</bundles_post_ra>
